<compile_context>
chip_gen: v7x
topology: tpu7x:2x2x1
jax: 0.10.0
libtpu: 0.0.40
codegen_flags: <defaults>
</compile_context>

<pallas_src>
import functools

import jax
import jax.numpy as jnp
from jax.experimental import pallas as pl
from jax.experimental.pallas import tpu as pltpu


def _largest_divisor_at_most(n, target):
    for d in range(min(n, target), 0, -1):
        if n % d == 0:
            return d
    return 1


def _lstm_fused_layer_kernel(x_ref, wih_ref, whh_ref, b_ref, h0_ref, c0_ref,
                             out_ref, h_sc, c_sc, gx_sc, *,
                             hidden_dim, unroll):
    """One LSTM layer: fused input projection + recurrence for one time tile.

    Grid: (T // Tt,), dimension_semantics=('arbitrary',) (serial recurrence).

    x_ref   : (Tt, B, E)   input tile for this time chunk
    wih_ref : (E, 4H)      input->gates weight (transposed), resident
    whh_ref : (H, 4H)      hidden->gates weight (transposed), resident
    b_ref   : (1, 4H)      b_ih + b_hh
    h0_ref  : (B, H)       initial hidden state (used only on grid step 0)
    c0_ref  : (B, H)       initial cell state   (used only on grid step 0)
    out_ref : (Tt, B, H)   hidden states for this time chunk
    h_sc, c_sc : VMEM (B, H) f32   state carried across grid steps
    gx_sc   : VMEM (Tt, B, 4H) f32 x-side gate pre-activations for this tile
    """
    H = hidden_dim
    Tt, B, E = x_ref.shape

    @pl.when(pl.program_id(0) == 0)
    def _():
        h_sc[...] = h0_ref[...].astype(jnp.float32)
        c_sc[...] = c0_ref[...].astype(jnp.float32)

    # Fused, time-parallel input projection for this tile: ONE MXU matmul,
    # bias folded in. Stored in VMEM scratch so the time loop only loads one
    # (B, 4H) slice per step (flat vreg pressure).
    x_flat = x_ref[...].reshape(Tt * B, E)
    gx_sc[...] = (
        jnp.dot(x_flat, wih_ref[...], preferred_element_type=jnp.float32)
        + b_ref[...]
    ).reshape(Tt, B, 4 * H)

    whh = whh_ref[...]                       # hoisted: loaded once per tile
    h_init = h_sc[...]
    c_init = c_sc[...]

    def step(t, carry):
        h_prev, c_prev = carry
        # Only the h-side matmul is on the serial critical path.
        gates = gx_sc[t] + jnp.dot(h_prev, whh,
                                   preferred_element_type=jnp.float32)
        # PyTorch gate order: [i, f, g, o].
        i_g = jax.nn.sigmoid(gates[:, 0 * H:1 * H])
        f_g = jax.nn.sigmoid(gates[:, 1 * H:2 * H])
        g_g = jnp.tanh(gates[:, 2 * H:3 * H])
        o_g = jax.nn.sigmoid(gates[:, 3 * H:4 * H])
        c_new = f_g * c_prev + i_g * g_g
        h_new = o_g * jnp.tanh(c_new)
        out_ref[t] = h_new.astype(out_ref.dtype)
        return (h_new, c_new)

    # Bounded unroll (not full-T): overlaps MXU latency with EUP/VPU gate math
    # across adjacent steps without spilling the vreg file at production T.
    h_last, c_last = jax.lax.fori_loop(0, Tt, step, (h_init, c_init),
                                       unroll=unroll)
    h_sc[...] = h_last
    c_sc[...] = c_last


def lstm_layer_pallas(x, w_ih, w_hh, b_ih, b_hh, h0, c0, *,
                      t_tile=32, unroll=4):
    """Run one LSTM layer over the full sequence with a single fused kernel.

    x    : (T, B, E) float32
    w_ih : (4H, E)   w_hh : (4H, H)   b_ih, b_hh : (4H,)
    h0, c0 : (B, H)
    returns outputs (T, B, H)
    """
    T, B, E = x.shape
    H = h0.shape[-1]
    G = 4 * H

    Tt = _largest_divisor_at_most(T, t_tile)
    n_tiles = T // Tt

    wih_t = jnp.transpose(w_ih)                  # (E, 4H)
    whh_t = jnp.transpose(w_hh)                  # (H, 4H)
    bias = (b_ih + b_hh).reshape(1, G)           # (1, 4H)

    kernel = functools.partial(_lstm_fused_layer_kernel,
                               hidden_dim=H,
                               unroll=min(unroll, Tt))

    out = pl.pallas_call(
        kernel,
        out_shape=jax.ShapeDtypeStruct((T, B, H), x.dtype),
        grid_spec=pltpu.PrefetchScalarGridSpec(
            num_scalar_prefetch=0,
            grid=(n_tiles,),
            in_specs=[
                pl.BlockSpec((Tt, B, E), lambda t: (t, 0, 0)),   # x time tile
                pl.BlockSpec((E, G), lambda t: (0, 0)),          # W_ih^T (resident)
                pl.BlockSpec((H, G), lambda t: (0, 0)),          # W_hh^T (resident)
                pl.BlockSpec((1, G), lambda t: (0, 0)),          # bias   (resident)
                pl.BlockSpec((B, H), lambda t: (0, 0)),          # h0     (resident)
                pl.BlockSpec((B, H), lambda t: (0, 0)),          # c0     (resident)
            ],
            out_specs=pl.BlockSpec((Tt, B, H), lambda t: (t, 0, 0)),
            scratch_shapes=[
                pltpu.VMEM((B, H), jnp.float32),     # h carry across tiles
                pltpu.VMEM((B, H), jnp.float32),     # c carry across tiles
                pltpu.VMEM((Tt, B, G), jnp.float32),  # per-tile x-side gates
            ],
        ),
        compiler_params=pltpu.CompilerParams(
            dimension_semantics=("arbitrary",),   # serial recurrence over time
            vmem_limit_bytes=48 * 1024 * 1024,
        ),
    )(x, wih_t, whh_t, bias, h0, c0)
    return out


def mlstm_forward(x, params, h0, c0, *, t_tile=32, unroll=4):
    """Full mLSTM forward: stacked LSTM layers, returns `outputs`.

    x  : (T, B, E)
    params : list of (w_ih, w_hh, b_ih, b_hh) per layer
    h0, c0 : (layers, B, H)
    """
    out = x
    for layer, (w_ih, w_hh, b_ih, b_hh) in enumerate(params):
        out = lstm_layer_pallas(out, w_ih, w_hh, b_ih, b_hh,
                                h0[layer], c0[layer],
                                t_tile=t_tile, unroll=unroll)
    return out


def _reference_lstm(x, params, h0, c0):
    """Pure-JAX reference (lax.scan) for correctness check."""
    out = x
    for layer, (w_ih, w_hh, b_ih, b_hh) in enumerate(params):
        H = h0.shape[-1]

        def step(carry, x_t, w_ih=w_ih, w_hh=w_hh, b_ih=b_ih, b_hh=b_hh, H=H):
            h, c = carry
            gates = x_t @ w_ih.T + b_ih + h @ w_hh.T + b_hh
            i = jax.nn.sigmoid(gates[:, 0 * H:1 * H])
            f = jax.nn.sigmoid(gates[:, 1 * H:2 * H])
            g = jnp.tanh(gates[:, 2 * H:3 * H])
            o = jax.nn.sigmoid(gates[:, 3 * H:4 * H])
            c_new = f * c + i * g
            h_new = o * jnp.tanh(c_new)
            return (h_new, c_new), h_new

        (_, _), out = jax.lax.scan(step, (h0[layer], c0[layer]), out)
    return out


if __name__ == "__main__":
    # Small shapes consistent with the module: seq=8, batch=4, embed=16,
    # hidden=32, layers=2.
    T, B, E, H, LAYERS = 8, 4, 16, 32, 2

    key = jax.random.PRNGKey(0)
    keys = jax.random.split(key, 4 * LAYERS + 3)

    # Deterministic parameter init (PyTorch uses U(-1/sqrt(H), 1/sqrt(H))).
    bound = 1.0 / jnp.sqrt(jnp.float32(H))
    params = []
    for layer in range(LAYERS):
        in_dim = E if layer == 0 else H
        k0, k1, k2, k3 = keys[4 * layer: 4 * layer + 4]
        w_ih = jax.random.uniform(k0, (4 * H, in_dim), jnp.float32, -bound, bound)
        w_hh = jax.random.uniform(k1, (4 * H, H), jnp.float32, -bound, bound)
        b_ih = jax.random.uniform(k2, (4 * H,), jnp.float32, -bound, bound)
        b_hh = jax.random.uniform(k3, (4 * H,), jnp.float32, -bound, bound)
        params.append((w_ih, w_hh, b_ih, b_hh))

    # init_hidden: torch.randn(...) -> deterministic normal draws here.
    h0 = jax.random.normal(keys[-3], (LAYERS, B, H), jnp.float32)
    c0 = jax.random.normal(keys[-2], (LAYERS, B, H), jnp.float32)

    x = jax.random.normal(keys[-1], (T, B, E), jnp.float32)

    # t_tile=4 -> grid of 2 time tiles per layer, exercising the VMEM scratch
    # carry of h/c across grid steps and the pipelined x-tile DMAs.
    out = mlstm_forward(x, params, h0, c0, t_tile=4, unroll=4)
    out = jax.block_until_ready(out)

    ref = _reference_lstm(x, params, h0, c0)
    assert out.shape == (T, B, H)
    assert jnp.allclose(out, ref, atol=1e-5, rtol=1e-5), "mismatch vs reference"

    print("KERNEL_OK")
</pallas_src>

<mosaic_0001>
module attributes {stable_mosaic.version = 11 : i64} {
  func.func @_lstm_fused_layer_kernel(%arg0: i32, %arg1: memref<4x4x16xf32, #tpu.memory_space<vmem>>, %arg2: memref<16x128xf32, #tpu.memory_space<vmem>>, %arg3: memref<32x128xf32, #tpu.memory_space<vmem>>, %arg4: memref<1x128xf32, #tpu.memory_space<vmem>>, %arg5: memref<4x32xf32, #tpu.memory_space<vmem>>, %arg6: memref<4x32xf32, #tpu.memory_space<vmem>>, %arg7: memref<4x4x32xf32, #tpu.memory_space<vmem>>, %arg8: memref<4x32xf32, #tpu.memory_space<vmem>>, %arg9: memref<4x32xf32, #tpu.memory_space<vmem>>, %arg10: memref<4x4x128xf32, #tpu.memory_space<vmem>>) attributes {dimension_semantics = [#tpu.dimension_semantics<arbitrary>], iteration_bounds = array<i64: 2>, scalar_prefetch = 0 : i64, scratch_operands = 3 : i64, tpu.core_type = #tpu.core_type<tc>, window_params = [{transform_indices = @transform_0, window_bounds = array<i64: 4, 4, 16>}, {pipeline_mode = #tpu.pipeline_mode<synchronous>, transform_indices = @transform_1, window_bounds = array<i64: 16, 128>}, {pipeline_mode = #tpu.pipeline_mode<synchronous>, transform_indices = @transform_2, window_bounds = array<i64: 32, 128>}, {pipeline_mode = #tpu.pipeline_mode<synchronous>, transform_indices = @transform_3, window_bounds = array<i64: 1, 128>}, {pipeline_mode = #tpu.pipeline_mode<synchronous>, transform_indices = @transform_4, window_bounds = array<i64: 4, 32>}, {pipeline_mode = #tpu.pipeline_mode<synchronous>, transform_indices = @transform_5, window_bounds = array<i64: 4, 32>}, {transform_indices = @transform_6, window_bounds = array<i64: 4, 4, 32>}]} {
    %c0_i32 = arith.constant 0 : i32
    %0 = arith.cmpi eq, %arg0, %c0_i32 : i32
    %1 = arith.extui %0 : i1 to i32
    %c0_i32_0 = arith.constant 0 : i32
    %2 = arith.cmpi ne, %1, %c0_i32_0 : i32
    scf.if %2 {
      %c0_53 = arith.constant 0 : index
      %c0_54 = arith.constant 0 : index
      %153 = vector.load %arg5[%c0_53, %c0_54] : memref<4x32xf32, #tpu.memory_space<vmem>>, vector<4x32xf32>
      %c0_55 = arith.constant 0 : index
      %c0_56 = arith.constant 0 : index
      %154 = vector.load %arg8[%c0_55, %c0_56] : memref<4x32xf32, #tpu.memory_space<vmem>>, vector<4x32xf32>
      tpu.vector_store %arg8[%c0_55, %c0_56], %153 {strides = array<i32>} : memref<4x32xf32, #tpu.memory_space<vmem>>, vector<4x32xf32>,
      %c0_57 = arith.constant 0 : index
      %c0_58 = arith.constant 0 : index
      %155 = vector.load %arg6[%c0_57, %c0_58] : memref<4x32xf32, #tpu.memory_space<vmem>>, vector<4x32xf32>
      %c0_59 = arith.constant 0 : index
      %c0_60 = arith.constant 0 : index
      %156 = vector.load %arg9[%c0_59, %c0_60] : memref<4x32xf32, #tpu.memory_space<vmem>>, vector<4x32xf32>
      tpu.vector_store %arg9[%c0_59, %c0_60], %155 {strides = array<i32>} : memref<4x32xf32, #tpu.memory_space<vmem>>, vector<4x32xf32>,
    } else {
    }
    %c0 = arith.constant 0 : index
    %c0_1 = arith.constant 0 : index
    %c0_2 = arith.constant 0 : index
    %3 = vector.load %arg1[%c0, %c0_1, %c0_2] : memref<4x4x16xf32, #tpu.memory_space<vmem>>, vector<4x4x16xf32>
    %4 = vector.shape_cast %3 : vector<4x4x16xf32> to vector<16x16xf32>
    %c0_3 = arith.constant 0 : index
    %c0_4 = arith.constant 0 : index
    %5 = vector.load %arg2[%c0_3, %c0_4] : memref<16x128xf32, #tpu.memory_space<vmem>>, vector<16x128xf32>
    %cst = arith.constant dense<0.000000e+00> : vector<16x128xf32>
    %6 = tpu.matmul %4, %5, %cst {dimension_numbers = #tpu.dot_dimension_numbers<[1], [0], [0], [1], [0, 0, 1, 1], [], []>} : vector<16x16xf32>, vector<16x128xf32>, vector<16x128xf32> -> vector<16x128xf32>
    %c0_5 = arith.constant 0 : index
    %c0_6 = arith.constant 0 : index
    %7 = vector.load %arg4[%c0_5, %c0_6] : memref<1x128xf32, #tpu.memory_space<vmem>>, vector<1x128xf32>
    %8 = vector.broadcast %7 : vector<1x128xf32> to vector<16x128xf32>
    %9 = arith.addf %6, %8 : vector<16x128xf32>
    %10 = vector.shape_cast %9 : vector<16x128xf32> to vector<4x4x128xf32>
    %c0_7 = arith.constant 0 : index
    %c0_8 = arith.constant 0 : index
    %c0_9 = arith.constant 0 : index
    %11 = vector.load %arg10[%c0_7, %c0_8, %c0_9] : memref<4x4x128xf32, #tpu.memory_space<vmem>>, vector<4x4x128xf32>
    tpu.vector_store %arg10[%c0_7, %c0_8, %c0_9], %10 {strides = array<i32>} : memref<4x4x128xf32, #tpu.memory_space<vmem>>, vector<4x4x128xf32>,
    %c0_10 = arith.constant 0 : index
    %c0_11 = arith.constant 0 : index
    %12 = vector.load %arg3[%c0_10, %c0_11] : memref<32x128xf32, #tpu.memory_space<vmem>>, vector<32x128xf32>
    %c0_12 = arith.constant 0 : index
    %c0_13 = arith.constant 0 : index
    %13 = vector.load %arg8[%c0_12, %c0_13] : memref<4x32xf32, #tpu.memory_space<vmem>>, vector<4x32xf32>
    %c0_14 = arith.constant 0 : index
    %c0_15 = arith.constant 0 : index
    %14 = vector.load %arg9[%c0_14, %c0_15] : memref<4x32xf32, #tpu.memory_space<vmem>>, vector<4x32xf32>
    %c0_i32_16 = arith.constant 0 : i32
    %15 = arith.index_cast %c0_i32_16 : i32 to index
    %c0_17 = arith.constant 0 : index
    %c0_18 = arith.constant 0 : index
    %16 = vector.load %arg10[%15, %c0_17, %c0_18] : memref<4x4x128xf32, #tpu.memory_space<vmem>>, vector<1x4x128xf32>
    %17 = vector.shape_cast %16 : vector<1x4x128xf32> to vector<4x128xf32>
    %cst_19 = arith.constant dense<0.000000e+00> : vector<4x128xf32>
    %18 = tpu.matmul %13, %12, %cst_19 {dimension_numbers = #tpu.dot_dimension_numbers<[1], [0], [0], [1], [0, 0, 1, 1], [], []>} : vector<4x32xf32>, vector<32x128xf32>, vector<4x128xf32> -> vector<4x128xf32>
    %19 = arith.addf %17, %18 : vector<4x128xf32>
    %20 = vector.extract_strided_slice %19 {offsets = [0, 0], sizes = [4, 32], strides = [1, 1]} : vector<4x128xf32> to vector<4x32xf32>
    %21 = arith.negf %20 : vector<4x32xf32>
    %22 = math.exp %21 : vector<4x32xf32>
    %cst_20 = arith.constant 1.000000e+00 : f32
    %23 = vector.broadcast %cst_20 : f32 to vector<4x32xf32>
    %24 = arith.addf %23, %22 : vector<4x32xf32>
    %25 = arith.divf %23, %24 : vector<4x32xf32>
    %26 = vector.extract_strided_slice %19 {offsets = [0, 32], sizes = [4, 32], strides = [1, 1]} : vector<4x128xf32> to vector<4x32xf32>
    %27 = arith.negf %26 : vector<4x32xf32>
    %28 = math.exp %27 : vector<4x32xf32>
    %cst_21 = arith.constant 1.000000e+00 : f32
    %29 = vector.broadcast %cst_21 : f32 to vector<4x32xf32>
    %30 = arith.addf %29, %28 : vector<4x32xf32>
    %31 = arith.divf %29, %30 : vector<4x32xf32>
    %32 = vector.extract_strided_slice %19 {offsets = [0, 64], sizes = [4, 32], strides = [1, 1]} : vector<4x128xf32> to vector<4x32xf32>
    %33 = math.tanh %32 : vector<4x32xf32>
    %34 = vector.extract_strided_slice %19 {offsets = [0, 96], sizes = [4, 32], strides = [1, 1]} : vector<4x128xf32> to vector<4x32xf32>
    %35 = arith.negf %34 : vector<4x32xf32>
    %36 = math.exp %35 : vector<4x32xf32>
    %cst_22 = arith.constant 1.000000e+00 : f32
    %37 = vector.broadcast %cst_22 : f32 to vector<4x32xf32>
    %38 = arith.addf %37, %36 : vector<4x32xf32>
    %39 = arith.divf %37, %38 : vector<4x32xf32>
    %40 = arith.mulf %31, %14 : vector<4x32xf32>
    %41 = arith.mulf %25, %33 : vector<4x32xf32>
    %42 = arith.addf %40, %41 : vector<4x32xf32>
    %43 = math.tanh %42 : vector<4x32xf32>
    %44 = arith.mulf %39, %43 : vector<4x32xf32>
    %45 = arith.index_cast %c0_i32_16 : i32 to index
    %c0_23 = arith.constant 0 : index
    %c0_24 = arith.constant 0 : index
    %46 = vector.load %arg7[%45, %c0_23, %c0_24] : memref<4x4x32xf32, #tpu.memory_space<vmem>>, vector<1x4x32xf32>
    %47 = vector.shape_cast %46 : vector<1x4x32xf32> to vector<4x32xf32>
    %48 = vector.shape_cast %44 : vector<4x32xf32> to vector<1x4x32xf32>
    tpu.vector_store %arg7[%45, %c0_23, %c0_24], %48 {strides = array<i32>} : memref<4x4x32xf32, #tpu.memory_space<vmem>>, vector<1x4x32xf32>,
    %c1_i32 = arith.constant 1 : i32
    %49 = arith.index_cast %c1_i32 : i32 to index
    %c0_25 = arith.constant 0 : index
    %c0_26 = arith.constant 0 : index
    %50 = vector.load %arg10[%49, %c0_25, %c0_26] : memref<4x4x128xf32, #tpu.memory_space<vmem>>, vector<1x4x128xf32>
    %51 = vector.shape_cast %50 : vector<1x4x128xf32> to vector<4x128xf32>
    %cst_27 = arith.constant dense<0.000000e+00> : vector<4x128xf32>
    %52 = tpu.matmul %44, %12, %cst_27 {dimension_numbers = #tpu.dot_dimension_numbers<[1], [0], [0], [1], [0, 0, 1, 1], [], []>} : vector<4x32xf32>, vector<32x128xf32>, vector<4x128xf32> -> vector<4x128xf32>
    %53 = arith.addf %51, %52 : vector<4x128xf32>
    %54 = vector.extract_strided_slice %53 {offsets = [0, 0], sizes = [4, 32], strides = [1, 1]} : vector<4x128xf32> to vector<4x32xf32>
    %55 = arith.negf %54 : vector<4x32xf32>
    %56 = math.exp %55 : vector<4x32xf32>
    %cst_28 = arith.constant 1.000000e+00 : f32
    %57 = vector.broadcast %cst_28 : f32 to vector<4x32xf32>
    %58 = arith.addf %57, %56 : vector<4x32xf32>
    %59 = arith.divf %57, %58 : vector<4x32xf32>
    %60 = vector.extract_strided_slice %53 {offsets = [0, 32], sizes = [4, 32], strides = [1, 1]} : vector<4x128xf32> to vector<4x32xf32>
    %61 = arith.negf %60 : vector<4x32xf32>
    %62 = math.exp %61 : vector<4x32xf32>
    %cst_29 = arith.constant 1.000000e+00 : f32
    %63 = vector.broadcast %cst_29 : f32 to vector<4x32xf32>
    %64 = arith.addf %63, %62 : vector<4x32xf32>
    %65 = arith.divf %63, %64 : vector<4x32xf32>
    %66 = vector.extract_strided_slice %53 {offsets = [0, 64], sizes = [4, 32], strides = [1, 1]} : vector<4x128xf32> to vector<4x32xf32>
    %67 = math.tanh %66 : vector<4x32xf32>
    %68 = vector.extract_strided_slice %53 {offsets = [0, 96], sizes = [4, 32], strides = [1, 1]} : vector<4x128xf32> to vector<4x32xf32>
    %69 = arith.negf %68 : vector<4x32xf32>
    %70 = math.exp %69 : vector<4x32xf32>
    %cst_30 = arith.constant 1.000000e+00 : f32
    %71 = vector.broadcast %cst_30 : f32 to vector<4x32xf32>
    %72 = arith.addf %71, %70 : vector<4x32xf32>
    %73 = arith.divf %71, %72 : vector<4x32xf32>
    %74 = arith.mulf %65, %42 : vector<4x32xf32>
    %75 = arith.mulf %59, %67 : vector<4x32xf32>
    %76 = arith.addf %74, %75 : vector<4x32xf32>
    %77 = math.tanh %76 : vector<4x32xf32>
    %78 = arith.mulf %73, %77 : vector<4x32xf32>
    %79 = arith.index_cast %c1_i32 : i32 to index
    %c0_31 = arith.constant 0 : index
    %c0_32 = arith.constant 0 : index
    %80 = vector.load %arg7[%79, %c0_31, %c0_32] : memref<4x4x32xf32, #tpu.memory_space<vmem>>, vector<1x4x32xf32>
    %81 = vector.shape_cast %80 : vector<1x4x32xf32> to vector<4x32xf32>
    %82 = vector.shape_cast %78 : vector<4x32xf32> to vector<1x4x32xf32>
    tpu.vector_store %arg7[%79, %c0_31, %c0_32], %82 {strides = array<i32>} : memref<4x4x32xf32, #tpu.memory_space<vmem>>, vector<1x4x32xf32>,
    %c2_i32 = arith.constant 2 : i32
    %83 = arith.index_cast %c2_i32 : i32 to index
    %c0_33 = arith.constant 0 : index
    %c0_34 = arith.constant 0 : index
    %84 = vector.load %arg10[%83, %c0_33, %c0_34] : memref<4x4x128xf32, #tpu.memory_space<vmem>>, vector<1x4x128xf32>
    %85 = vector.shape_cast %84 : vector<1x4x128xf32> to vector<4x128xf32>
    %cst_35 = arith.constant dense<0.000000e+00> : vector<4x128xf32>
    %86 = tpu.matmul %78, %12, %cst_35 {dimension_numbers = #tpu.dot_dimension_numbers<[1], [0], [0], [1], [0, 0, 1, 1], [], []>} : vector<4x32xf32>, vector<32x128xf32>, vector<4x128xf32> -> vector<4x128xf32>
    %87 = arith.addf %85, %86 : vector<4x128xf32>
    %88 = vector.extract_strided_slice %87 {offsets = [0, 0], sizes = [4, 32], strides = [1, 1]} : vector<4x128xf32> to vector<4x32xf32>
    %89 = arith.negf %88 : vector<4x32xf32>
    %90 = math.exp %89 : vector<4x32xf32>
    %cst_36 = arith.constant 1.000000e+00 : f32
    %91 = vector.broadcast %cst_36 : f32 to vector<4x32xf32>
    %92 = arith.addf %91, %90 : vector<4x32xf32>
    %93 = arith.divf %91, %92 : vector<4x32xf32>
    %94 = vector.extract_strided_slice %87 {offsets = [0, 32], sizes = [4, 32], strides = [1, 1]} : vector<4x128xf32> to vector<4x32xf32>
    %95 = arith.negf %94 : vector<4x32xf32>
    %96 = math.exp %95 : vector<4x32xf32>
    %cst_37 = arith.constant 1.000000e+00 : f32
    %97 = vector.broadcast %cst_37 : f32 to vector<4x32xf32>
    %98 = arith.addf %97, %96 : vector<4x32xf32>
    %99 = arith.divf %97, %98 : vector<4x32xf32>
    %100 = vector.extract_strided_slice %87 {offsets = [0, 64], sizes = [4, 32], strides = [1, 1]} : vector<4x128xf32> to vector<4x32xf32>
    %101 = math.tanh %100 : vector<4x32xf32>
    %102 = vector.extract_strided_slice %87 {offsets = [0, 96], sizes = [4, 32], strides = [1, 1]} : vector<4x128xf32> to vector<4x32xf32>
    %103 = arith.negf %102 : vector<4x32xf32>
    %104 = math.exp %103 : vector<4x32xf32>
    %cst_38 = arith.constant 1.000000e+00 : f32
    %105 = vector.broadcast %cst_38 : f32 to vector<4x32xf32>
    %106 = arith.addf %105, %104 : vector<4x32xf32>
    %107 = arith.divf %105, %106 : vector<4x32xf32>
    %108 = arith.mulf %99, %76 : vector<4x32xf32>
    %109 = arith.mulf %93, %101 : vector<4x32xf32>
    %110 = arith.addf %108, %109 : vector<4x32xf32>
    %111 = math.tanh %110 : vector<4x32xf32>
    %112 = arith.mulf %107, %111 : vector<4x32xf32>
    %113 = arith.index_cast %c2_i32 : i32 to index
    %c0_39 = arith.constant 0 : index
    %c0_40 = arith.constant 0 : index
    %114 = vector.load %arg7[%113, %c0_39, %c0_40] : memref<4x4x32xf32, #tpu.memory_space<vmem>>, vector<1x4x32xf32>
    %115 = vector.shape_cast %114 : vector<1x4x32xf32> to vector<4x32xf32>
    %116 = vector.shape_cast %112 : vector<4x32xf32> to vector<1x4x32xf32>
    tpu.vector_store %arg7[%113, %c0_39, %c0_40], %116 {strides = array<i32>} : memref<4x4x32xf32, #tpu.memory_space<vmem>>, vector<1x4x32xf32>,
    %c3_i32 = arith.constant 3 : i32
    %117 = arith.index_cast %c3_i32 : i32 to index
    %c0_41 = arith.constant 0 : index
    %c0_42 = arith.constant 0 : index
    %118 = vector.load %arg10[%117, %c0_41, %c0_42] : memref<4x4x128xf32, #tpu.memory_space<vmem>>, vector<1x4x128xf32>
    %119 = vector.shape_cast %118 : vector<1x4x128xf32> to vector<4x128xf32>
    %cst_43 = arith.constant dense<0.000000e+00> : vector<4x128xf32>
    %120 = tpu.matmul %112, %12, %cst_43 {dimension_numbers = #tpu.dot_dimension_numbers<[1], [0], [0], [1], [0, 0, 1, 1], [], []>} : vector<4x32xf32>, vector<32x128xf32>, vector<4x128xf32> -> vector<4x128xf32>
    %121 = arith.addf %119, %120 : vector<4x128xf32>
    %122 = vector.extract_strided_slice %121 {offsets = [0, 0], sizes = [4, 32], strides = [1, 1]} : vector<4x128xf32> to vector<4x32xf32>
    %123 = arith.negf %122 : vector<4x32xf32>
    %124 = math.exp %123 : vector<4x32xf32>
    %cst_44 = arith.constant 1.000000e+00 : f32
    %125 = vector.broadcast %cst_44 : f32 to vector<4x32xf32>
    %126 = arith.addf %125, %124 : vector<4x32xf32>
    %127 = arith.divf %125, %126 : vector<4x32xf32>
    %128 = vector.extract_strided_slice %121 {offsets = [0, 32], sizes = [4, 32], strides = [1, 1]} : vector<4x128xf32> to vector<4x32xf32>
    %129 = arith.negf %128 : vector<4x32xf32>
    %130 = math.exp %129 : vector<4x32xf32>
    %cst_45 = arith.constant 1.000000e+00 : f32
    %131 = vector.broadcast %cst_45 : f32 to vector<4x32xf32>
    %132 = arith.addf %131, %130 : vector<4x32xf32>
    %133 = arith.divf %131, %132 : vector<4x32xf32>
    %134 = vector.extract_strided_slice %121 {offsets = [0, 64], sizes = [4, 32], strides = [1, 1]} : vector<4x128xf32> to vector<4x32xf32>
    %135 = math.tanh %134 : vector<4x32xf32>
    %136 = vector.extract_strided_slice %121 {offsets = [0, 96], sizes = [4, 32], strides = [1, 1]} : vector<4x128xf32> to vector<4x32xf32>
    %137 = arith.negf %136 : vector<4x32xf32>
    %138 = math.exp %137 : vector<4x32xf32>
    %cst_46 = arith.constant 1.000000e+00 : f32
    %139 = vector.broadcast %cst_46 : f32 to vector<4x32xf32>
    %140 = arith.addf %139, %138 : vector<4x32xf32>
    %141 = arith.divf %139, %140 : vector<4x32xf32>
    %142 = arith.mulf %133, %110 : vector<4x32xf32>
    %143 = arith.mulf %127, %135 : vector<4x32xf32>
    %144 = arith.addf %142, %143 : vector<4x32xf32>
    %145 = math.tanh %144 : vector<4x32xf32>
    %146 = arith.mulf %141, %145 : vector<4x32xf32>
    %147 = arith.index_cast %c3_i32 : i32 to index
    %c0_47 = arith.constant 0 : index
    %c0_48 = arith.constant 0 : index
    %148 = vector.load %arg7[%147, %c0_47, %c0_48] : memref<4x4x32xf32, #tpu.memory_space<vmem>>, vector<1x4x32xf32>
    %149 = vector.shape_cast %148 : vector<1x4x32xf32> to vector<4x32xf32>
    %150 = vector.shape_cast %146 : vector<4x32xf32> to vector<1x4x32xf32>
    tpu.vector_store %arg7[%147, %c0_47, %c0_48], %150 {strides = array<i32>} : memref<4x4x32xf32, #tpu.memory_space<vmem>>, vector<1x4x32xf32>,
    %c4_i32 = arith.constant 4 : i32
    %c0_49 = arith.constant 0 : index
    %c0_50 = arith.constant 0 : index
    %151 = vector.load %arg8[%c0_49, %c0_50] : memref<4x32xf32, #tpu.memory_space<vmem>>, vector<4x32xf32>
    tpu.vector_store %arg8[%c0_49, %c0_50], %146 {strides = array<i32>} : memref<4x32xf32, #tpu.memory_space<vmem>>, vector<4x32xf32>,
    %c0_51 = arith.constant 0 : index
    %c0_52 = arith.constant 0 : index
    %152 = vector.load %arg9[%c0_51, %c0_52] : memref<4x32xf32, #tpu.memory_space<vmem>>, vector<4x32xf32>
    tpu.vector_store %arg9[%c0_51, %c0_52], %144 {strides = array<i32>} : memref<4x32xf32, #tpu.memory_space<vmem>>, vector<4x32xf32>,
    return
  }
  func.func @transform_0(%arg0: i32) -> (i32, i32, i32) {
    %c0_i32 = arith.constant 0 : i32
    %c0_i32_0 = arith.constant 0 : i32
    %c0_i32_1 = arith.constant 0 : i32
    return %arg0, %c0_i32, %c0_i32_0 : i32, i32, i32
  }
  func.func @transform_1(%arg0: i32) -> (i32, i32) {
    %c0_i32 = arith.constant 0 : i32
    %c0_i32_0 = arith.constant 0 : i32
    %c0_i32_1 = arith.constant 0 : i32
    return %c0_i32, %c0_i32_0 : i32, i32
  }
  func.func @transform_2(%arg0: i32) -> (i32, i32) {
    %c0_i32 = arith.constant 0 : i32
    %c0_i32_0 = arith.constant 0 : i32
    %c0_i32_1 = arith.constant 0 : i32
    return %c0_i32, %c0_i32_0 : i32, i32
  }
  func.func @transform_3(%arg0: i32) -> (i32, i32) {
    %c0_i32 = arith.constant 0 : i32
    %c0_i32_0 = arith.constant 0 : i32
    %c0_i32_1 = arith.constant 0 : i32
    return %c0_i32, %c0_i32_0 : i32, i32
  }
  func.func @transform_4(%arg0: i32) -> (i32, i32) {
    %c0_i32 = arith.constant 0 : i32
    %c0_i32_0 = arith.constant 0 : i32
    %c0_i32_1 = arith.constant 0 : i32
    return %c0_i32, %c0_i32_0 : i32, i32
  }
  func.func @transform_5(%arg0: i32) -> (i32, i32) {
    %c0_i32 = arith.constant 0 : i32
    %c0_i32_0 = arith.constant 0 : i32
    %c0_i32_1 = arith.constant 0 : i32
    return %c0_i32, %c0_i32_0 : i32, i32
  }
  func.func @transform_6(%arg0: i32) -> (i32, i32, i32) {
    %c0_i32 = arith.constant 0 : i32
    %c0_i32_0 = arith.constant 0 : i32
    %c0_i32_1 = arith.constant 0 : i32
    return %arg0, %c0_i32, %c0_i32_0 : i32, i32, i32
  }
}

</mosaic_0001>

<bundles_post_ra>
// kernel: tpu_custom_call.1
= control target key start
LH: loop header
LB: loop body
LE: loop exit
PB: predicated region body
PF: predicated region fallthrough
CT: control target
= control target key end

     0   :  { %11 = vsyncpa [#allocation6], 0  ;;  %s1732_s0 = inlined_call_operand.hbm [shape: f32[8,4,16], index: 0, kind: input, shape index: {}]   ;;  %s1733_s1 = inlined_call_operand.hbm [shape: f32[16,128], index: 1, kind: input, shape index: {}]   ;;  %s1734_s2 = inlined_call_operand.hbm [shape: f32[32,128], index: 2, kind: input, shape index: {}]   ;;  %s1735_s3 = inlined_call_operand.vmem [shape: f32[1,128], index: 3, kind: input, shape index: {}]   ;;  %s1736_s4 = inlined_call_operand.vmem [shape: f32[4,32], index: 4, kind: input, shape index: {}]   ;;  %s1737_s5 = inlined_call_operand.vmem [shape: f32[4,32], index: 5, kind: input, shape index: {}]   ;;  %s1738_s6 = inlined_call_operand.hbm [shape: f32[8,4,32], index: 6, kind: output, shape index: {}]  }
   0x1   :  { %13 = vsyncpa [#allocation6 + $0x1], 0 }
   0x2   :  { %14 = vsyncpa [#allocation9], 0 }
   0x3   :  { %15 = vsyncpa [#allocation7], 0 }
   0x4   :  { %17 = vsyncpa [#allocation7 + $0x1], 0  ;;  %s1420_s21 = smov 0   ;;  %s1422_s22 = smov 0  }
   0x5   :  { %s1424_s23 = smov 0   ;;  %s1426_s24 = smov 0  }
   0x6 LB: > { %s1441_s25 = sadd.s32 4294967295, %s1368_s24   ;;  %s962_s26 = sadd.s32 4294967294, %s1368_s24   ;;  %s1368_s24 = sphi %s1426_s24, %s1759_s24   ;;  %s1364_s23 = sphi %s1424_s23, %s1758_s23   ;;  %s1360_s22 = sphi %s1422_s22, %s1757_s22   ;;  %s1356_s21 = sphi %s1420_s21, %s1756_s21  }
   0x7   : > { %p43_p0 = scmp.ne.s32.totalorder %s1360_s22, %s1356_s21  ;;  %p1739_p1 = scmp.eq.s32.totalorder %s1441_s25, 0 }
   0x8   : > { %p178_p3 = scmp.eq.s32.totalorder %s962_s26, 1  ;;  %p963_p5 = scmp.ge.s32.totalorder %s1368_s24, 1 }
   0x9   : > { %p1450_p4 = por %p1739_p1, %p43_p0  ;;  %p185_p7 = scmp.lt.s32.totalorder %s1368_s24, 3 }
   0xa   : > { %p1455_p6 = por %p178_p3, %p43_p0  ;;  %s1370_s30 = smov [#allocation8]  }
   0xb   : > { %s1742_s27 = scalar_select %p1450_p4, 1, 0 }
   0xc   : > { %s1743_s28 = scalar_select %p1455_p6, 1, 0 }
   0xd   : > { %p1461_p9 = pnand %p963_p5, %p185_p7  ;;  %s197_s7 = sshll.u32 %s1370_s30, 4  ;;  %s1465_s7 = int_to_ptr.vmem [resolvable:$true] %s197_s7 }
   0xe   : > { %s1371_s9 = smov [#allocation10]   ;;  %s1212_s13 = scalar_lea.hbm %s1733_s1, 256 }
   0xf   : > { %p1112_p10 = pneg %p1461_p9  ;;  %s210_s10 = sshll.u32 %s1371_s9, 4  ;;  %s1476_s10 = int_to_ptr.vmem [resolvable:$true] %s210_s10 }
  0x10   : > { %p1213_p13 = scmp.ne.s32.totalorder %s1733_s1, %s1212_s13  ;;  %p1219_p7 = scmp.lt.u32.totalorder %s1212_s13, %s1733_s1 }
  0x11   : > { %p1472_p12 = pnand %p1112_p10, %p1739_p1 }
  0x13   : > { %p1214_p0 = pneg %p1472_p12 }
  0x15   : > { %p1215_p3 = pnand %p1214_p0, %p1213_p13 }
  0x17   : > { %p1216_p5 = pneg %p1215_p3 }
  0x19   : > { %p1221_p10 = pnand %p1219_p7, %p1216_p5 }
  0x1b   : > { %1224 = shalt.err (!%p1221_p10)
}
  0x1c   : > { %s1225_s18 = scalar_lea.vmem %s1465_s7, 256  ;;  %p1233_p2 = scmp.lt.s32.totalorder %s1465_s7, %s1465_s7 }
  0x1d   : > { %p1226_p11 = scmp.ne.s32.totalorder %s1465_s7, %s1225_s18  ;;  %p1234_p13 = scmp.lt.s32.totalorder %s1225_s18, %s1225_s18 }
  0x1f   : > { %p1228_p8 = pnand %p1226_p11, %p1214_p0  ;;  %p1235_p3 = por %p1234_p13, %p1233_p2 }
  0x21   : > { %p1229_p1 = pneg %p1228_p8 }
  0x23   : > { %p1236_p6 = pnand %p1235_p3, %p1229_p1 }
  0x25   : > { %1239 = shalt.err (!%p1236_p6)
}
  0x26   : > { %s1372_s19 = smov 128   ;;  %s1373_s20 = smov 8  }
  0x27   : > { %1115 = dma.hbm_to_vmem [thread:$0]  (!%p1472_p12), %s1733_s1, 256, %s1465_s7, [#allocation9], %s1372_s19, %s1372_s19, %s1373_s20  }
  0x28   : > { %s1240_s12 = scalar_lea.hbm %s1734_s2, 512 }
  0x29   : > { %p1241_p2 = scmp.ne.s32.totalorder %s1734_s2, %s1240_s12  ;;  %p1247_p8 = scmp.lt.u32.totalorder %s1240_s12, %s1734_s2 }
  0x2b   : > { %p1243_p1 = pnand %p1241_p2, %p1214_p0 }
  0x2d   : > { %p1244_p6 = pneg %p1243_p1 }
  0x2f   : > { %p1249_p11 = pnand %p1247_p8, %p1244_p6 }
  0x31   : > { %1252 = shalt.err (!%p1249_p11)
}
  0x32   : > { %s1253_s7 = scalar_lea.vmem %s1476_s10, 512  ;;  %p1261_p13 = scmp.lt.s32.totalorder %s1476_s10, %s1476_s10 }
  0x33   : > { %p1254_p5 = scmp.ne.s32.totalorder %s1476_s10, %s1253_s7  ;;  %p1262_p3 = scmp.lt.s32.totalorder %s1253_s7, %s1253_s7 }
  0x35   : > { %p1256_p7 = pnand %p1254_p5, %p1214_p0  ;;  %p1263_p2 = por %p1262_p3, %p1261_p13 }
  0x37   : > { %p1257_p10 = pneg %p1256_p7 }
  0x39   : > { %p1264_p1 = pnand %p1263_p2, %p1257_p10 }
  0x3b   : > { %1267 = shalt.err (!%p1264_p1)
}
  0x3c   : > { %1118 = dma.hbm_to_vmem [thread:$0]  (!%p1472_p12), %s1734_s2, 512, %s1476_s10, [#allocation9], %s1372_s19, %s1372_s19, %s1373_s20  }
  0x3d   : > { %s1531_s26 = sadd.s32 1, %s1368_s24   ;;  %s30_s8 = sadd.s32 1, %s1364_s23 }
  0x3e   : > { %s27_s30 = ssub.s32 %s1368_s24, %s1531_s26  ;;  %p37_p0 = scmp.ne.s32.totalorder %s1364_s23, %s1360_s22 }
  0x3f   : > { %p28_p6 = scmp.eq.s32.totalorder %s27_s30, 0  ;;  %p38_p8 = scmp.eq.s32.totalorder %s1368_s24, 0 }
  0x40   : > { %p1746_p11 = scmp.eq.s32.totalorder %s1441_s25, 1  ;;  %p1129_p7 = scmp.lt.s32.totalorder %s1368_s24, 2 }
  0x41   : > { %s1547_s11 = scalar_select %p28_p6, %s1364_s23, %s30_s8  }
  0x42   : > { %p1541_p5 = por %p1746_p11, %p37_p0  ;;  %p39_p10 = por %p38_p8, %p37_p0 }
  0x43   : > { %s233_s12 = sand.u32 1, %s1364_s23   ;;  %s995_s10 = sshll.u32 %s1368_s24, 8 }
  0x44   : > { %s1747_s9 = scalar_select %p1541_p5, 1, 0 }
  0x45   : > { %s967_s13 = sshll.u32 %s233_s12, 4  ;;  %s1554_s14 = scalar_lea.hbm %s1732_s0, %s995_s10 }
  0x46   : > { %s237_s15 = scalar_lea.vmem [#allocation5], %s967_s13  ;;  %p1558_p12 = pnand %p1129_p7, %p39_p10 }
  0x47   : > { %s244_s16 = sshll.u32 %s237_s15, 4  ;;  %s1562_s17 = scalar_lea.sflag [#allocation6], %s233_s12  ;;  %s1556_s16 = int_to_ptr.vmem [resolvable:$true] %s244_s16 }
  0x48   : > { %s1268_s18 = scalar_lea.hbm %s1554_s14, 256  ;;  %p1270_p3 = pneg %p1558_p12 }
  0x49   : > { %p1269_p13 = scmp.ne.s32.totalorder %s1554_s14, %s1268_s18  ;;  %s1273_s13 = scalar_lea.hbm %s1732_s0, 512 }
  0x4a   : > { %p1274_p0 = scmp.lt.u32.totalorder %s1554_s14, %s1732_s0  ;;  %p1275_p6 = scmp.lt.u32.totalorder %s1273_s13, %s1268_s18 }
  0x4b   : > { %p1271_p2 = pnand %p1270_p3, %p1269_p13  ;;  %p1277_p11 = scmp.lt.u32.totalorder %s1268_s18, %s1554_s14 }
  0x4c   : > { %p1276_p8 = por %p1275_p6, %p1274_p0 }
  0x4d   : > { %p1272_p1 = pneg %p1271_p2 }
  0x4e   : > { %p1278_p7 = por %p1277_p11, %p1276_p8 }
  0x50   : > { %p1279_p10 = pnand %p1278_p7, %p1272_p1 }
  0x52   : > { %1282 = shalt.err (!%p1279_p10)
}
  0x53   : > { %s1283_s12 = scalar_lea.vmem %s1556_s16, 256  ;;  %s1374_s20 = smov [#allocation5]  }
  0x54   : > { %p1284_p13 = scmp.ne.s32.totalorder %s1556_s16, %s1283_s12  ;;  %s1288_s15 = sshll.u32 %s1374_s20, 4  ;;  %s1289_s15 = int_to_ptr.vmem [resolvable:$false] %s1288_s15 }
  0x55   : > { %s1290_s8 = scalar_lea.vmem %s1289_s15, 512  ;;  %p1291_p4 = scmp.lt.s32.totalorder %s1556_s16, %s1289_s15 }
  0x56   : > { %p1286_p2 = pnand %p1284_p13, %p1270_p3  ;;  %p1292_p0 = scmp.lt.s32.totalorder %s1290_s8, %s1283_s12 }
  0x58   : > { %p1287_p5 = pneg %p1286_p2  ;;  %p1293_p6 = por %p1292_p0, %p1291_p4 }
  0x5a   : > { %p1294_p8 = pnand %p1293_p6, %p1287_p5 }
  0x5c   : > { %1297 = shalt.err (!%p1294_p8)
}
  0x5d   : > { %s1375_s18 = smov 64   ;;  %s1376_s30 = smov 4  }
  0x5e   : > { %1122 = dma.hbm_to_vmem [thread:$0]  (!%p1558_p12), %s1554_s14, 256, %s1556_s16, %s1562_s17, %s1375_s18, %s1375_s18, %s1376_s30  }
  0x5f   : > { %256 = sbr.rel (%p1461_p9) target bundleno = 2956 (0xb8c), region = 44  ;;  %s1593_s13 = sand.u32 (!%p1461_p9), 1, %s1360_s22  }
  0x60   : > { %s971_s10 = sshll.u32 (!%p1461_p9), %s1593_s13, 4  ;;  %s259_s19 = scalar_lea.sflag (!%p1461_p9), [#allocation6], %s1593_s13 }
  0x61   : > { %s262_s12 = scalar_lea.vmem (!%p1461_p9), [#allocation5], %s971_s10  ;;  %p1749_p4 = scmp.ne.s32.totalorder (!%p1461_p9), %s1742_s27, 0 }
  0x66   : > { %1343 = dma.done.wait (%p1749_p4), %s259_s19, 256  }
  0x67   : > { %1345 = vsyncadd (%p1749_p4), %s259_s19, 4294967040  ;;  %p1750_p5 = scmp.eq.s32.totalorder %s1441_s25, 0 }
  0x69   : > { %1347 = dma.done.wait (%p1750_p5), [#allocation9], 768   ;;  %p1751_p12 = pmov %p1750_p5 }
  0x6a   : > { %s1605_s29 = scalar_lea.vmem [#allocation11], %s971_s10  ;;  %p1752_p9 = scmp.ne.s32.totalorder %s1441_s25, 0 }
  0x6b   : > { %1349 = vsyncadd (%p1751_p12), [#allocation9], 4294966528  ;;  %v305_v0 = vld [vmem:[%s1736_s4] sm:$0xf] (!%p1752_p9)  ;;  %vm306_vm0 = vcmask (!%p1752_p9), 257024  }
  0x6c   : > { %304 = sbr.rel (%p1752_p9) target bundleno = 115 (0x73), region = 60  ;;  %v308_v1 = vld [vmem:[%s1737_s5] sm:$0xf] (!%p1752_p9)  ;;  %307 = vst.msk [vmem:[#allocation2] sm:$0xf] (!%p1752_p9), %vm306_vm0, %v305_v0 }
  0x6d   : > { %309 = vst.msk [vmem:[#allocation3] sm:$0xf] (!%p1752_p9), %vm306_vm0, %v308_v1 }
  0x73 PF: > { %v314_v2 = vld [vmem:[#allocation8] sm:$0xff]  ;;  %v315_v3 = vld [vmem:[#allocation8 + $0x8] sm:$0xff]  ;;  %vm329_vm1 = vcmask 130048   ;;  %v1377_v6 = vmov 0.0|0.0   ;;  %v419_v8 = vld [vmem:[#allocation10] sm:$0xff]  ;;  %vm1378_vm2 = vmmov 0  }
  0x74   : > { %v1072_v4 = vpack.c.bf16 %v315_v3, %v314_v2  ;;  %v1178_v5 = vld [vmem:[%s262_s12] sm:$0xff]   ;;  %1076 = vmatprep.subr.bf16.mxu1 %v1377_v6  ;;  %v1179_v7 = vld [vmem:[%s262_s12 + $0x8] sm:$0xff]   ;;  %v1379_v13 = vmov 0.0   ;;  %vm426_vm3 = vcmask 261120   ;;  %s1380_s15 = smov 64   ;;  %s1381_s8 = smov 32  }
  0x75   : > { %1025 = vmatprep.mubr.msk.f32.mxu0 %vm329_vm1, %v1178_v5  ;;  %v420_v9 = vld [vmem:[#allocation10 + $0x8] sm:$0xff]  ;;  %v421_v10 = vld [vmem:[#allocation10 + $0x10] sm:$0xff]  ;;  %v422_v11 = vld [vmem:[#allocation10 + $0x18] sm:$0xff]  ;;  %1036 = vmatprep.mubr.msk.f32.mxu1 %vm1378_vm2, %v1379_v13  ;;  %vm533_vm4 = vcmask 257024   ;;  %s1382_s18 = smov 96   ;;  %s996_s30 = sshll.u32 %s1441_s25, 8 }
  0x76   : > { %1073 = vmatprep.subr.bf16.mxu0 %v1072_v4  ;;  %v1617_v12 = vpack.c.bf16 %v420_v9, %v419_v8  ;;  %v1623_v14 = vpack.c.bf16 %v422_v11, %v421_v10  ;;  %v423_v15 = vld [vmem:[#allocation2] sm:$0xf]  ;;  %v424_v28 = vld [vmem:[#allocation3] sm:$0xf]  ;;  %s870_s10 = sshll.u32 %s1605_s29, 4  ;;  %s1681_s14 = scalar_lea.hbm %s1738_s6, %s996_s30  ;;  %s1683_s10 = int_to_ptr.vmem [resolvable:$true] %s870_s10 }
  0x77   : > { %1075 = vmatpush3.bf16.msra.mxu0 %v1072_v4  ;;  %v976_v16 = vld [vmem:[%s1735_s3] ss:$0 sm:$0xff]  ;;  %s857_s16 = scalar_lea.sflag [#allocation7], %s1593_s13  ;;  %s1298_s7 = scalar_lea.vmem %s1683_s10, 256 }
  0x78   : > { %1082 = vmatprep.subr.bf16.mxu0 %v1377_v6  ;;  %1078 = vmatpush3.bf16.msra.mxu1 %v1617_v12  ;;  %p1299_p3 = scmp.ne.s32.totalorder %s1683_s10, %s1298_s7  ;;  %p1753_p1 = scmp.ne.s32.totalorder %s1747_s9, 0 }
  0x79   : > { %1079 = vmatprep.subr.bf16.mxu1 %v1377_v6  ;;  %s1383_s25 = smov [#allocation11]  }
  0x7a   : > { %1026 = vmatmul.mubr.msk.f32.vlgmr.msra.gmra.mrb[0].mxu0 %vm329_vm1, %v1179_v7  ;;  %p1300_p11 = pnand %p1299_p3, %p1753_p1  ;;  %s1302_s17 = sshll.u32 %s1383_s25, 4  ;;  %s1303_s17 = int_to_ptr.vmem [resolvable:$false] %s1302_s17 }
  0x7b   : > { %1084 = vmatpush3.bf16.msra.mxu0 %v1617_v12  ;;  %1047 = vmatprep.mubr.msk.f32.mxu0 %vm1378_vm2, %v1379_v13  ;;  %s1304_s27 = scalar_lea.vmem %s1303_s17, 512  ;;  %p1305_p10 = scmp.lt.s32.totalorder %s1683_s10, %s1303_s17 }
  0x7c   : > { %1085 = vmatprep.subr.bf16.mxu0 %v1377_v6  ;;  %1081 = vmatpush3.bf16.msra.mxu1 %v1623_v14  ;;  %p1301_p7 = pneg %p1300_p11  ;;  %p1306_p13 = scmp.lt.s32.totalorder %s1304_s27, %s1298_s7 }
  0x7d   : > { %1088 = vmatprep.subr.bf16.mxu1 %v1377_v6 }
  0x7e   : > { %p1307_p2 = por %p1306_p13, %p1305_p10 }
  0x7f   : > { %1087 = vmatpush3.bf16.msra.mxu0 %v1623_v14  ;;  %1037 = vmatmul.mubr.msk.f32.vlgmr.msra.gmra.mrb[0].mxu1 %vm426_vm3, %v423_v15 }
  0x80   : > { %1094 = vmatprep.subr.bf16.mxu0 %v1377_v6  ;;  %1090 = vmatpush3.bf16.msra.mxu1 %v1617_v12  ;;  %p1308_p0 = pnand %p1307_p2, %p1301_p7 }
  0x81   : > { %1058 = vmatprep.mubr.msk.f32.mxu1 %vm1378_vm2, %v1379_v13  ;;  %1091 = vmatprep.subr.bf16.mxu1 %v1377_v6 }
  0x84   : > { %1093 = vmatpush3.bf16.msra.mxu1 %v1623_v14 }
 0x14d   : > { %v1027_v17 = vpop.f32.mrb[0].mxu0 }
 0x14e   : > { %v406_v18 = vadd.f32 %v1027_v17, %v976_v16  ;;  %v400_v19 = vpop.f32.mrb[1].mxu0 }
 0x14f   : > { %v401_v20 = vadd.f32 %v976_v16, %v400_v19 }
 0x150   : > { %v412_v21 = vcombine.high %v406_v18, %v406_v18  ;;  %417 = vst [vmem:[#allocation4 + $0x8] sm:$0xf] %v406_v18 }
 0x151   : > { %v411_v22 = vcombine.high %v401_v20, %v401_v20  ;;  %415 = vst [vmem:[#allocation4] sm:$0xf] %v401_v20 }
 0x152   : > { %418 = vst [vmem:[#allocation4 + $0xc] sm:$0xf] %v412_v21  ;;  %v496_v23 = vpop.f32.mrb[0].mxu1 }
 0x153   : > { %416 = vst [vmem:[#allocation4 + $0x4] sm:$0xf] %v411_v22  ;;  %v1038_v24 = vpop.f32.mrb[1].mxu1 }
 0x157   : > { %v641_v61 = vld [vmem:[#allocation4 + $0x8] sm:$0xf] }
 0x158   : > { %v425_v25 = vld [vmem:[#allocation4] sm:$0xf] }
 0x159   : > { %v500_v26 = vadd.f32 %v496_v23, %v425_v25  ;;  %v746_v15 = vld [vmem:[#allocation4 + $0xc] sm:$0xf] }
 0x15a   : > { %v536_v43 = vld [vmem:[#allocation4 + $0x4] sm:$0xf] }
 0x15b   : > { %1180 = vtanh.f32 %v500_v26  ;;  %v980_v29 = vmul.f32 -1.442695, %v500_v26 }
 0x15d   : > { %1182 = vpow2.f32 %v980_v29 }
 0x165   : > { %v1181_v27 = vpop.eup %1180 }
 0x166   : > { %514 = vrot.lane.b32.xlu0 %v1181_v27, %s1380_s15 }
 0x167   : > { %v1183_v30 = vpop.eup %1182 }
 0x168   : > { %v504_v31 = vadd.f32 1.0, %v1183_v30 }
 0x16a   : > { %509 = vrot.lane.b32.xlu0 %v424_v28, %s1381_s8  ;;  %1184 = vrcp.f32 %v504_v31 }
 0x174   : > { %v1185_v32 = vpop.eup %1184 }
 0x1d8   : > { %v515_v33 = vpop.permute.xlu0 %514 }
 0x1d9   : > { %v517_v34 = vmul.f32 %v1185_v32, %v515_v33 }
 0x1db   : > { %519 = vrot.lane.b32.xlu1 %v517_v34, %s1381_s8 }
 0x1dc   : > { %v510_v35 = vpop.permute.xlu0 %509 }
 0x1dd   : > { %v512_v36 = vmul.f32 %v1185_v32, %v510_v35 }
 0x24d   : > { %v520_v37 = vpop.permute.xlu1 %519 }
 0x24e   : > { %v522_v38 = vadd.f32 %v520_v37, %v512_v36 }
 0x250   : > { %1186 = vtanh.f32 %v522_v38 }
 0x25a   : > { %v1187_v39 = vpop.eup %1186 }
 0x25b   : > { %525 = vrot.lane.b32.xlu1 %v1187_v39, %s1380_s15 }
 0x2cd   : > { %v526_v40 = vpop.permute.xlu1 %525 }
 0x2ce   : > { %v528_v41 = vmul.f32 %v1185_v32, %v526_v40 }
 0x2d0   : > { %530 = vrot.lane.b32.xlu0 %v528_v41, %s1381_s8 }
 0x342   : > { %v531_v42 = vpop.permute.xlu0 %530 }
 0x343   : > { %534 = vst.msk [vmem:[%s1605_s29] sm:$0xf] %vm533_vm4, %v531_v42  ;;  %1048 = vmatmul.mubr.msk.f32.vlgmr.msra.gmra.mrb[2].mxu0 %vm426_vm3, %v531_v42 }
 0x344   : > { %1096 = vmatpush3.bf16.msra.mxu0 %v1617_v12  ;;  %1069 = vmatprep.mubr.msk.f32.mxu0 %vm1378_vm2, %v1379_v13 }
 0x345   : > { %1097 = vmatprep.subr.bf16.mxu0 %v1377_v6 }
 0x348   : > { %1099 = vmatpush3.bf16.msra.mxu0 %v1623_v14 }
 0x416   : > { %v605_v44 = vpop.f32.mrb[2].mxu0 }
 0x417   : > { %v609_v45 = vadd.f32 %v605_v44, %v536_v43  ;;  %v1049_v46 = vpop.f32.mrb[3].mxu0 }
 0x419   : > { %1188 = vtanh.f32 %v609_v45  ;;  %v982_v48 = vmul.f32 -1.442695, %v609_v45 }
 0x41b   : > { %1190 = vpow2.f32 %v982_v48 }
 0x423   : > { %v1189_v47 = vpop.eup %1188 }
 0x424   : > { %619 = vrot.lane.b32.xlu1 %v1189_v47, %s1380_s15 }
 0x425   : > { %v1191_v49 = vpop.eup %1190 }
 0x426   : > { %v613_v50 = vadd.f32 1.0, %v1191_v49 }
 0x428   : > { %1192 = vrcp.f32 %v613_v50 }
 0x432   : > { %v1193_v51 = vpop.eup %1192 }
 0x433   : > { %v617_v54 = vmul.f32 %v1193_v51, %v522_v38 }
 0x496   : > { %v620_v52 = vpop.permute.xlu1 %619 }
 0x497   : > { %v622_v53 = vmul.f32 %v1193_v51, %v620_v52 }
 0x499   : > { %624 = vrot.lane.b32.xlu0 %v622_v53, %s1381_s8 }
 0x50b   : > { %v625_v55 = vpop.permute.xlu0 %624 }
 0x50c   : > { %v627_v56 = vadd.f32 %v625_v55, %v617_v54 }
 0x50e   : > { %1194 = vtanh.f32 %v627_v56 }
 0x518   : > { %v1195_v57 = vpop.eup %1194 }
 0x519   : > { %630 = vrot.lane.b32.xlu1 %v1195_v57, %s1380_s15 }
 0x58b   : > { %v631_v58 = vpop.permute.xlu1 %630 }
 0x58c   : > { %v633_v59 = vmul.f32 %v1193_v51, %v631_v58 }
 0x58e   : > { %635 = vrot.lane.b32.xlu0 %v633_v59, %s1381_s8 }
 0x600   : > { %v636_v60 = vpop.permute.xlu0 %635 }
 0x601   : > { %983 = vst.msk [vmem:[%s1605_s29 + $0x4] sm:$0xf] %vm533_vm4, %v636_v60  ;;  %1059 = vmatmul.mubr.msk.f32.vlgmr.msra.gmra.mrb[2].mxu1 %vm426_vm3, %v636_v60 }
 0x6d4   : > { %v710_v62 = vpop.f32.mrb[2].mxu1 }
 0x6d5   : > { %v714_v63 = vadd.f32 %v710_v62, %v641_v61  ;;  %v1060_v0 = vpop.f32.mrb[3].mxu1 }
 0x6d7   : > { %1196 = vtanh.f32 %v714_v63  ;;  %v985_v2 = vmul.f32 -1.442695, %v714_v63 }
 0x6d9   : > { %1198 = vpow2.f32 %v985_v2 }
 0x6e1   : > { %v1197_v1 = vpop.eup %1196 }
 0x6e2   : > { %724 = vrot.lane.b32.xlu1 %v1197_v1, %s1380_s15 }
 0x6e3   : > { %v1199_v3 = vpop.eup %1198 }
 0x6e4   : > { %v718_v4 = vadd.f32 1.0, %v1199_v3 }
 0x6e6   : > { %1200 = vrcp.f32 %v718_v4 }
 0x6f0   : > { %v1201_v5 = vpop.eup %1200 }
 0x6f1   : > { %v722_v8 = vmul.f32 %v1201_v5, %v627_v56 }
 0x754   : > { %v725_v6 = vpop.permute.xlu1 %724 }
 0x755   : > { %v727_v7 = vmul.f32 %v1201_v5, %v725_v6 }
 0x757   : > { %729 = vrot.lane.b32.xlu0 %v727_v7, %s1381_s8 }
 0x7c9   : > { %v730_v9 = vpop.permute.xlu0 %729 }
 0x7ca   : > { %v732_v10 = vadd.f32 %v730_v9, %v722_v8 }
 0x7cc   : > { %1202 = vtanh.f32 %v732_v10 }
 0x7d6   : > { %v1203_v11 = vpop.eup %1202 }
 0x7d7   : > { %735 = vrot.lane.b32.xlu1 %v1203_v11, %s1380_s15 }
 0x849   : > { %v736_v12 = vpop.permute.xlu1 %735 }
 0x84a   : > { %v738_v13 = vmul.f32 %v1201_v5, %v736_v12 }
 0x84c   : > { %740 = vrot.lane.b32.xlu0 %v738_v13, %s1381_s8 }
 0x8be   : > { %v741_v14 = vpop.permute.xlu0 %740 }
 0x8bf   : > { %986 = vst.msk [vmem:[%s1605_s29 + $0x8] sm:$0xf] %vm533_vm4, %v741_v14  ;;  %1070 = vmatmul.mubr.msk.f32.vlgmr.msra.gmra.mrb[4].mxu0 %vm426_vm3, %v741_v14 }
 0x992   : > { %v815_v16 = vpop.f32.mrb[4].mxu0 }
 0x993   : > { %v819_v17 = vadd.f32 %v815_v16, %v746_v15  ;;  %v1071_v18 = vpop.f32.mrb[5].mxu0 }
 0x995   : > { %1204 = vtanh.f32 %v819_v17  ;;  %v988_v20 = vmul.f32 -1.442695, %v819_v17 }
 0x997   : > { %1206 = vpow2.f32 %v988_v20 }
 0x99f   : > { %v1205_v19 = vpop.eup %1204 }
 0x9a0   : > { %829 = vrot.lane.b32.xlu1 %v1205_v19, %s1380_s15 }
 0x9a1   : > { %v1207_v21 = vpop.eup %1206 }
 0x9a2   : > { %v823_v22 = vadd.f32 1.0, %v1207_v21 }
 0x9a4   : > { %1208 = vrcp.f32 %v823_v22 }
 0x9ae   : > { %v1209_v23 = vpop.eup %1208 }
 0x9af   : > { %v827_v26 = vmul.f32 %v1209_v23, %v732_v10 }
 0xa12   : > { %v830_v24 = vpop.permute.xlu1 %829 }
 0xa13   : > { %v832_v25 = vmul.f32 %v1209_v23, %v830_v24 }
 0xa15   : > { %834 = vrot.lane.b32.xlu0 %v832_v25, %s1381_s8 }
 0xa87   : > { %v835_v27 = vpop.permute.xlu0 %834 }
 0xa88   : > { %v837_v28 = vadd.f32 %v835_v27, %v827_v26 }
 0xa8a   : > { %1210 = vtanh.f32 %v837_v28 }
 0xa94   : > { %v1211_v29 = vpop.eup %1210 }
 0xa95   : > { %840 = vrot.lane.b32.xlu1 %v1211_v29, %s1380_s15 }
 0xa99   : > { %852 = vrot.lane.b32.xlu1 %v837_v28, %s1382_s18 }
 0xb07   : > { %v841_v30 = vpop.permute.xlu1 %840 }
 0xb08   : > { %v843_v31 = vmul.f32 %v1209_v23, %v841_v30 }
 0xb0a   : > { %845 = vrot.lane.b32.xlu0 %v843_v31, %s1381_s8 }
 0xb0b   : > { %v853_v32 = vpop.permute.xlu1 %852 }
 0xb0c   : > { %855 = vst.msk [vmem:[#allocation3] sm:$0xf] %vm533_vm4, %v853_v32 }
 0xb7c   : > { %v846_v33 = vpop.permute.xlu0 %845 }
 0xb7d   : > { %989 = vst.msk [vmem:[%s1605_s29 + $0xc] sm:$0xf] %vm533_vm4, %v846_v33  ;;  %850 = vst.msk [vmem:[#allocation2] sm:$0xf] %vm533_vm4, %v846_v33 }
 0xb7e   : > { %1311 = shalt.err (!%p1308_p0)
}
 0xb7f   : > { %s1312_s29 = scalar_lea.hbm %s1681_s14, 256  ;;  %s1316_s18 = scalar_lea.hbm %s1738_s6, 512 }
 0xb80   : > { %p1313_p6 = scmp.ne.s32.totalorder %s1681_s14, %s1312_s29  ;;  %p1317_p5 = scmp.lt.u32.totalorder %s1681_s14, %s1738_s6 }
 0xb81   : > { %p1318_p12 = scmp.lt.u32.totalorder %s1316_s18, %s1312_s29  ;;  %p1320_p3 = scmp.lt.u32.totalorder %s1312_s29, %s1681_s14 }
 0xb82   : > { %p1314_p8 = pnand %p1313_p6, %p1753_p1 }
 0xb83   : > { %p1319_p9 = por %p1318_p12, %p1317_p5 }
 0xb84   : > { %p1315_p4 = pneg %p1314_p8 }
 0xb85   : > { %p1321_p11 = por %p1320_p3, %p1319_p9 }
 0xb87   : > { %p1322_p7 = pnand %p1321_p11, %p1315_p4 }
 0xb89   : > { %1325 = shalt.err (!%p1322_p7)
}
 0xb8a   : > { %s1384_s12 = smov 4  }
 0xb8b   : > { %1110 = dma.vmem_to_hbm [thread:$0]  (%p1753_p1), %s1683_s10, 256, %s1681_s14, %s857_s16, %s1380_s15, %s1380_s15, %s1384_s12  }
 0xb8c PF: > { %s885_s7 = sand.u32 1, %s1356_s21   ;;  %p1754_p10 = scmp.ne.s32.totalorder %s1743_s28, 0 }
 0xb8d   : > { %p1755_p13 = scmp.ge.s32.totalorder %s1368_s24, 2  ;;  %s886_s25 = scalar_lea.sflag [#allocation7], %s885_s7 }
 0xb8f   : > { %p1124_p2 = pnand %p1755_p13, %p1754_p10 }
 0xb91   : > { %1351 = dma.done.wait (!%p1124_p2), %s886_s25, 256  }
 0xb92   : > { %1353 = vsyncadd (!%p1124_p2), %s886_s25, 4294967040  ;;  %p20_p0 = scmp.ge.s32.totalorder %s1531_s26, 4   ;;  %s1756_s21 = smov %s1360_s22 }
 0xb93   : > { %s1757_s22 = smov %s1364_s23  ;;  %s1758_s23 = smov %s1547_s11 }
 0xb94   : > { %s1759_s24 = smov %s1531_s26  ;;  %22 = sbr.rel (!%p20_p0) target bundleno = 6 (0x6), region = 107 }
 0xb9b   :  { %891 = vsyncpa [#allocation6], 1 }
 0xb9c   :  { %893 = vsyncpa [#allocation6 + $0x1], 1 }
 0xb9d   :  { %894 = vsyncpa [#allocation9], 1 }
 0xb9e   :  { %895 = vsyncpa [#allocation7], 1 }
 0xb9f   :  { %897 = vsyncpa [#allocation7 + $0x1], 1 }

</bundles_post_ra>
